<compile_context>
chip_gen: v6e
topology: v6e:2x2x1
jax: 0.10.0
libtpu: 0.0.40
codegen_flags: <defaults>
</compile_context>

<pallas_src>
import jax
import jax.numpy as jnp
from jax.experimental import pallas as pl
from jax.experimental.pallas import tpu as pltpu

# Target ~4 MiB per block: near the measured HBM-roofline plateau, while
# 2x(in + out) double-buffering (~16 MiB) fits every generation's VMEM.
_TARGET_BLOCK_BYTES = 4 << 20
# Candidate lane-dense widths (all multiples of 128), widest first.
_COL_CANDIDATES = (8192, 4096, 2048, 1024, 512, 256, 128)


def _swish_kernel(x_ref, o_ref):
    x = x_ref[...]
    xf = x.astype(jnp.float32)  # f32 compute matches torch.sigmoid semantics
    o_ref[...] = (xf * jax.nn.sigmoid(xf)).astype(o_ref.dtype)


def _sublane_multiple(dtype) -> int:
    itemsize = jnp.dtype(dtype).itemsize
    if itemsize >= 4:
        return 8
    if itemsize == 2:
        return 16
    return 32


@jax.jit
def swish_pallas(x: jax.Array) -> jax.Array:
    """Elementwise Swish (x * sigmoid(x)) via Pallas. Any shape, float dtype."""
    orig_shape = x.shape
    orig_dtype = x.dtype
    itemsize = jnp.dtype(orig_dtype).itemsize
    sub = _sublane_multiple(orig_dtype)

    n = x.size
    # Widest lane-dense column count that divides n exactly (no flat padding);
    # otherwise fall back to 128 and pad only the ragged tail.
    cols = 128
    for c in _COL_CANDIDATES:
        if n >= c and n % c == 0:
            cols = c
            break

    flat = x.reshape(-1)
    n_pad = pl.cdiv(n, cols) * cols
    if n_pad != n:
        flat = jnp.pad(flat, (0, n_pad - n))  # swish(0)=0; sliced off below
    rows = n_pad // cols

    # Block rows: aim at _TARGET_BLOCK_BYTES, rounded to the dtype's sublane
    # packing multiple.
    tile_rows = min(rows, max(1, _TARGET_BLOCK_BYTES // (cols * itemsize)))
    tile_rows = max(sub, (tile_rows // sub) * sub)

    rows_pad = pl.cdiv(rows, tile_rows) * tile_rows
    x2d = flat.reshape(rows, cols)
    if rows_pad != rows:
        x2d = jnp.pad(x2d, ((0, rows_pad - rows), (0, 0)))

    grid = (rows_pad // tile_rows,)

    # Double-buffered in + out = 4 * block bytes; give ~2x headroom, raise the
    # v5e 16 MiB scoped default, stay under v7x's 64 MiB physical VMEM.
    block_bytes = tile_rows * cols * itemsize
    vmem_limit = int(min(48 << 20, max(32 << 20, 8 * block_bytes)))

    out2d = pl.pallas_call(
        _swish_kernel,
        out_shape=jax.ShapeDtypeStruct((rows_pad, cols), orig_dtype),
        grid_spec=pltpu.PrefetchScalarGridSpec(
            num_scalar_prefetch=0,
            grid=grid,
            in_specs=[pl.BlockSpec((tile_rows, cols), lambda i: (i, 0))],
            out_specs=pl.BlockSpec((tile_rows, cols), lambda i: (i, 0)),
        ),
        compiler_params=pltpu.CompilerParams(
            dimension_semantics=("parallel",),
            vmem_limit_bytes=vmem_limit,
        ),
    )(x2d)

    out = out2d
    if rows_pad != rows:
        out = out[:rows]
    out = out.reshape(-1)
    if n_pad != n:
        out = out[:n]
    return out.reshape(orig_shape)


if __name__ == "__main__":
    key = jax.random.PRNGKey(0)

    # Small NCHW input consistent with the module's typical use.
    x = jax.random.normal(key, (2, 4, 16, 16), dtype=jnp.float32)
    y = swish_pallas(x)
    jax.block_until_ready(y)
    ref = x * jax.nn.sigmoid(x)
    assert y.shape == x.shape and y.dtype == x.dtype
    assert jnp.max(jnp.abs(y - ref)) < 1e-5

    # Second check: exercises lane-dense tiling with a multi-step grid.
    x2 = jax.random.normal(jax.random.PRNGKey(1), (8, 32, 64, 64), dtype=jnp.float32)
    y2 = swish_pallas(x2)
    jax.block_until_ready(y2)
    ref2 = x2 * jax.nn.sigmoid(x2)
    assert jnp.max(jnp.abs(y2 - ref2)) < 1e-5

    print("KERNEL_OK")
</pallas_src>

<mosaic_0001>
module attributes {stable_mosaic.version = 11 : i64} {
  func.func @_swish_kernel(%arg0: i32, %arg1: memref<8x2048xf32, #tpu.memory_space<vmem>>, %arg2: memref<8x2048xf32, #tpu.memory_space<vmem>>) attributes {dimension_semantics = [#tpu.dimension_semantics<parallel>], iteration_bounds = array<i64: 1>, scalar_prefetch = 0 : i64, scratch_operands = 0 : i64, tpu.core_type = #tpu.core_type<tc>, window_params = [{transform_indices = @transform_0, window_bounds = array<i64: 8, 2048>}, {transform_indices = @transform_1, window_bounds = array<i64: 8, 2048>}]} {
    %c0 = arith.constant 0 : index
    %c0_0 = arith.constant 0 : index
    %0 = vector.load %arg1[%c0, %c0_0] : memref<8x2048xf32, #tpu.memory_space<vmem>>, vector<8x2048xf32>
    %1 = arith.negf %0 : vector<8x2048xf32>
    %2 = math.exp %1 : vector<8x2048xf32>
    %cst = arith.constant 1.000000e+00 : f32
    %3 = vector.broadcast %cst : f32 to vector<8x2048xf32>
    %4 = arith.addf %3, %2 : vector<8x2048xf32>
    %5 = arith.divf %3, %4 : vector<8x2048xf32>
    %6 = arith.mulf %0, %5 : vector<8x2048xf32>
    %c0_1 = arith.constant 0 : index
    %c0_2 = arith.constant 0 : index
    %7 = vector.load %arg2[%c0_1, %c0_2] : memref<8x2048xf32, #tpu.memory_space<vmem>>, vector<8x2048xf32>
    tpu.vector_store %arg2[%c0_1, %c0_2], %6 {strides = array<i32>} : memref<8x2048xf32, #tpu.memory_space<vmem>>, vector<8x2048xf32>,
    return
  }
  func.func @transform_0(%arg0: i32) -> (i32, i32) {
    %c0_i32 = arith.constant 0 : i32
    %c0_i32_0 = arith.constant 0 : i32
    return %arg0, %c0_i32 : i32, i32
  }
  func.func @transform_1(%arg0: i32) -> (i32, i32) {
    %c0_i32 = arith.constant 0 : i32
    %c0_i32_0 = arith.constant 0 : i32
    return %arg0, %c0_i32 : i32, i32
  }
}

</mosaic_0001>

<bundles_post_ra>
// kernel: swish_pallas.1
= control target key start
LH: loop header
LB: loop body
LE: loop exit
PB: predicated region body
PF: predicated region fallthrough
CT: control target
= control target key end

     0   :  { %s406_s0 = inlined_call_operand.vmem [shape: f32[8,2048], index: 0, kind: input, shape index: {}]   ;;  %s407_s1 = inlined_call_operand.vmem [shape: f32[8,2048], index: 1, kind: output, shape index: {}]  }
   0x1   :  { %v249_v0 = vld [vmem:[%s406_s0] sm:$0xff]  ;;  %v254_v1 = vld [vmem:[%s406_s0 + $0x8] sm:$0xff]  ;;  %v259_v2 = vld [vmem:[%s406_s0 + $0x10] sm:$0xff] }
   0x2   :  { %v156_v3 = vmul.f32 -1.442695, %v249_v0  ;;  %v157_v4 = vmul.f32 -1.442695, %v254_v1  ;;  %v158_v5 = vmul.f32 -1.442695, %v259_v2 }
   0x3   :  { %v267_v6 = vld [vmem:[%s406_s0 + $0x18] sm:$0xff]  ;;  %v272_v7 = vld [vmem:[%s406_s0 + $0x20] sm:$0xff]  ;;  %v277_v8 = vld [vmem:[%s406_s0 + $0x28] sm:$0xff] }
   0x4   :  { %172 = vpow2.f32 %v156_v3  ;;  %v159_v9 = vmul.f32 -1.442695, %v267_v6  ;;  %v160_v10 = vmul.f32 -1.442695, %v272_v7  ;;  %v161_v11 = vmul.f32 -1.442695, %v277_v8 }
   0x5   :  { %174 = vpow2.f32 %v157_v4  ;;  %v285_v12 = vld [vmem:[%s406_s0 + $0x30] sm:$0xff]  ;;  %v290_v13 = vld [vmem:[%s406_s0 + $0x38] sm:$0xff]  ;;  %v295_v14 = vld [vmem:[%s406_s0 + $0x40] sm:$0xff] }
   0x6   :  { %176 = vpow2.f32 %v158_v5  ;;  %v162_v15 = vmul.f32 -1.442695, %v285_v12  ;;  %v163_v16 = vmul.f32 -1.442695, %v290_v13  ;;  %v302_v17 = vld [vmem:[%s406_s0 + $0x48] sm:$0xff]  ;;  %v307_v18 = vld [vmem:[%s406_s0 + $0x50] sm:$0xff] }
   0x7   :  { %178 = vpow2.f32 %v159_v9  ;;  %v164_v19 = vmul.f32 -1.442695, %v295_v14  ;;  %v313_v20 = vld [vmem:[%s406_s0 + $0x58] sm:$0xff]  ;;  %v165_v21 = vmul.f32 -1.442695, %v302_v17  ;;  %v319_v22 = vld [vmem:[%s406_s0 + $0x60] sm:$0xff] }
   0x8   :  { %180 = vpow2.f32 %v160_v10  ;;  %v166_v23 = vmul.f32 -1.442695, %v307_v18  ;;  %v325_v24 = vld [vmem:[%s406_s0 + $0x68] sm:$0xff]  ;;  %v167_v25 = vmul.f32 -1.442695, %v313_v20  ;;  %v331_v26 = vld [vmem:[%s406_s0 + $0x70] sm:$0xff] }
   0x9   :  { %182 = vpow2.f32 %v161_v11  ;;  %v168_v27 = vmul.f32 -1.442695, %v319_v22  ;;  %v337_v28 = vld [vmem:[%s406_s0 + $0x78] sm:$0xff]  ;;  %v169_v29 = vmul.f32 -1.442695, %v325_v24 }
   0xa   :  { %184 = vpow2.f32 %v162_v15  ;;  %v170_v30 = vmul.f32 -1.442695, %v331_v26  ;;  %v171_v31 = vmul.f32 -1.442695, %v337_v28 }
   0xb   :  { %186 = vpow2.f32 %v163_v16 }
   0xc   :  { %188 = vpow2.f32 %v164_v19 }
   0xd   :  { %190 = vpow2.f32 %v165_v21 }
   0xe   :  { %192 = vpow2.f32 %v166_v23 }
   0xf   :  { %194 = vpow2.f32 %v167_v25 }
  0x10   :  { %196 = vpow2.f32 %v168_v27 }
  0x11   :  { %v173_v32 = vpop.eup %172  ;;  %198 = vpow2.f32 %v169_v29 }
  0x12   :  { %v175_v33 = vpop.eup %174  ;;  %v72_v34 = vadd.f32 1.0, %v173_v32  ;;  %200 = vpow2.f32 %v170_v30 }
  0x13   :  { %v177_v35 = vpop.eup %176  ;;  %v73_v36 = vadd.f32 1.0, %v175_v33  ;;  %202 = vpow2.f32 %v171_v31 }
  0x14   :  { %v179_v37 = vpop.eup %178  ;;  %204 = vrcp.f32 %v72_v34  ;;  %v74_v38 = vadd.f32 1.0, %v177_v35 }
  0x15   :  { %v181_v39 = vpop.eup %180  ;;  %206 = vrcp.f32 %v73_v36  ;;  %v75_v40 = vadd.f32 1.0, %v179_v37 }
  0x16   :  { %v183_v41 = vpop.eup %182  ;;  %208 = vrcp.f32 %v74_v38  ;;  %v76_v42 = vadd.f32 1.0, %v181_v39 }
  0x17   :  { %v185_v43 = vpop.eup %184  ;;  %210 = vrcp.f32 %v75_v40  ;;  %v77_v44 = vadd.f32 1.0, %v183_v41 }
  0x18   :  { %v187_v45 = vpop.eup %186  ;;  %212 = vrcp.f32 %v76_v42  ;;  %v78_v46 = vadd.f32 1.0, %v185_v43 }
  0x19   :  { %v189_v47 = vpop.eup %188  ;;  %214 = vrcp.f32 %v77_v44  ;;  %v79_v48 = vadd.f32 1.0, %v187_v45 }
  0x1a   :  { %v191_v49 = vpop.eup %190  ;;  %216 = vrcp.f32 %v78_v46  ;;  %v80_v50 = vadd.f32 1.0, %v189_v47 }
  0x1b   :  { %v193_v51 = vpop.eup %192  ;;  %218 = vrcp.f32 %v79_v48  ;;  %v81_v52 = vadd.f32 1.0, %v191_v49 }
  0x1c   :  { %v195_v53 = vpop.eup %194  ;;  %220 = vrcp.f32 %v80_v50  ;;  %v82_v54 = vadd.f32 1.0, %v193_v51 }
  0x1d   :  { %v197_v55 = vpop.eup %196  ;;  %222 = vrcp.f32 %v81_v52  ;;  %v83_v56 = vadd.f32 1.0, %v195_v53 }
  0x1e   :  { %v199_v57 = vpop.eup %198  ;;  %224 = vrcp.f32 %v82_v54  ;;  %v84_v58 = vadd.f32 1.0, %v197_v55 }
  0x1f   :  { %v201_v59 = vpop.eup %200  ;;  %226 = vrcp.f32 %v83_v56  ;;  %v85_v60 = vadd.f32 1.0, %v199_v57 }
  0x20   :  { %v203_v61 = vpop.eup %202  ;;  %228 = vrcp.f32 %v84_v58  ;;  %v86_v62 = vadd.f32 1.0, %v201_v59 }
  0x21   :  { %v205_v63 = vpop.eup %204  ;;  %230 = vrcp.f32 %v85_v60  ;;  %v87_v3 = vadd.f32 1.0, %v203_v61 }
  0x22   :  { %v207_v4 = vpop.eup %206  ;;  %v120_v5 = vmul.f32 %v205_v63, %v249_v0  ;;  %232 = vrcp.f32 %v86_v62 }
  0x23   :  { %v209_v9 = vpop.eup %208  ;;  %v121_v10 = vmul.f32 %v207_v4, %v254_v1  ;;  %234 = vrcp.f32 %v87_v3 }
  0x24   :  { %v211_v11 = vpop.eup %210  ;;  %136 = vst [vmem:[%s407_s1] sm:$0xff] %v120_v5  ;;  %v122_v15 = vmul.f32 %v209_v9, %v259_v2 }
  0x25   :  { %v213_v16 = vpop.eup %212  ;;  %137 = vst [vmem:[%s407_s1 + $0x8] sm:$0xff] %v121_v10  ;;  %v123_v19 = vmul.f32 %v211_v11, %v267_v6 }
  0x26   :  { %v215_v0 = vpop.eup %214  ;;  %138 = vst [vmem:[%s407_s1 + $0x10] sm:$0xff] %v122_v15  ;;  %v124_v1 = vmul.f32 %v213_v16, %v272_v7 }
  0x27   :  { %v217_v21 = vpop.eup %216  ;;  %139 = vst [vmem:[%s407_s1 + $0x18] sm:$0xff] %v123_v19  ;;  %v125_v2 = vmul.f32 %v215_v0, %v277_v8 }
  0x28   :  { %v219_v23 = vpop.eup %218  ;;  %140 = vst [vmem:[%s407_s1 + $0x20] sm:$0xff] %v124_v1  ;;  %v126_v6 = vmul.f32 %v217_v21, %v285_v12 }
  0x29   :  { %v221_v25 = vpop.eup %220  ;;  %141 = vst [vmem:[%s407_s1 + $0x28] sm:$0xff] %v125_v2  ;;  %v127_v7 = vmul.f32 %v219_v23, %v290_v13 }
  0x2a   :  { %v223_v27 = vpop.eup %222  ;;  %142 = vst [vmem:[%s407_s1 + $0x30] sm:$0xff] %v126_v6  ;;  %v128_v8 = vmul.f32 %v221_v25, %v295_v14 }
  0x2b   :  { %v225_v29 = vpop.eup %224  ;;  %143 = vst [vmem:[%s407_s1 + $0x38] sm:$0xff] %v127_v7  ;;  %v129_v12 = vmul.f32 %v223_v27, %v302_v17 }
  0x2c   :  { %v227_v30 = vpop.eup %226  ;;  %144 = vst [vmem:[%s407_s1 + $0x40] sm:$0xff] %v128_v8  ;;  %v130_v13 = vmul.f32 %v225_v29, %v307_v18 }
  0x2d   :  { %v229_v31 = vpop.eup %228  ;;  %145 = vst [vmem:[%s407_s1 + $0x48] sm:$0xff] %v129_v12  ;;  %v131_v14 = vmul.f32 %v227_v30, %v313_v20 }
  0x2e   :  { %v231_v32 = vpop.eup %230  ;;  %146 = vst [vmem:[%s407_s1 + $0x50] sm:$0xff] %v130_v13  ;;  %v132_v17 = vmul.f32 %v229_v31, %v319_v22 }
  0x2f   :  { %v233_v33 = vpop.eup %232  ;;  %147 = vst [vmem:[%s407_s1 + $0x58] sm:$0xff] %v131_v14  ;;  %v133_v18 = vmul.f32 %v231_v32, %v325_v24 }
  0x30   :  { %v235_v34 = vpop.eup %234  ;;  %148 = vst [vmem:[%s407_s1 + $0x60] sm:$0xff] %v132_v17  ;;  %v134_v20 = vmul.f32 %v233_v33, %v331_v26 }
  0x31   :  { %149 = vst [vmem:[%s407_s1 + $0x68] sm:$0xff] %v133_v18  ;;  %v135_v22 = vmul.f32 %v235_v34, %v337_v28 }
  0x32   :  { %150 = vst [vmem:[%s407_s1 + $0x70] sm:$0xff] %v134_v20 }
  0x33   :  { %151 = vst [vmem:[%s407_s1 + $0x78] sm:$0xff] %v135_v22 }

</bundles_post_ra>
